<compile_context>
chip_gen: v7x
topology: tpu7x:2x2x1
jax: 0.10.0
libtpu: 0.0.40
codegen_flags: <defaults>
</compile_context>

<pallas_src>
import math
import functools

import jax
import jax.numpy as jnp
from jax.experimental import pallas as pl
from jax.experimental.pallas import tpu as pltpu


# ---------------------------------------------------------------------------
# bpp kernel:  sum(-log2(x)) over a whole array, tiled over leading dims
# ---------------------------------------------------------------------------
def _neglog2_sum_kernel(x_ref, o_ref, acc_ref):
    i = pl.program_id(0)

    @pl.when(i == 0)
    def _init():
        acc_ref[...] = jnp.zeros_like(acc_ref)

    acc_ref[...] += jnp.sum(-jnp.log2(x_ref[...].astype(jnp.float32)), keepdims=True)

    @pl.when(i == pl.num_programs(0) - 1)
    def _emit():
        o_ref[...] = acc_ref[...]


def neglog2_sum(x):
    """sum(-log2(x)) over all elements. Zero-copy: grid over flattened leading dims."""
    x = x.astype(jnp.float32)
    if x.ndim < 3:
        x = x.reshape((1,) * (3 - x.ndim) + x.shape)
    h, w = x.shape[-2], x.shape[-1]
    xb = x.reshape(-1, h, w)          # free reshape (leading-dim flatten)
    B = xb.shape[0]

    out = pl.pallas_call(
        _neglog2_sum_kernel,
        out_shape=jax.ShapeDtypeStruct((1, 1), jnp.float32),
        grid=(B,),
        in_specs=[pl.BlockSpec((None, h, w), lambda i: (i, 0, 0))],
        out_specs=pl.BlockSpec((1, 1), lambda i: (0, 0)),
        scratch_shapes=[pltpu.VMEM((1, 1), jnp.float32)],
        compiler_params=pltpu.CompilerParams(dimension_semantics=("arbitrary",)),
    )(xb)
    return out[0, 0]


# ---------------------------------------------------------------------------
# PSNR kernel: per-sample MSE over (C,H,W), tiled over row chunks -> 10*log10(1/mse)
# ---------------------------------------------------------------------------
def _psnr_kernel(x_ref, y_ref, o_ref, acc_ref, *, rows, tile_rows, inv_n):
    j = pl.program_id(1)

    @pl.when(j == 0)
    def _init():
        acc_ref[...] = jnp.zeros_like(acc_ref)

    d = x_ref[...].astype(jnp.float32) - y_ref[...].astype(jnp.float32)
    if rows % tile_rows != 0:
        # Last chunk of each sample is partial: mask out-of-bounds rows.
        ridx = jax.lax.broadcasted_iota(jnp.int32, d.shape, 0) + j * tile_rows
        d = jnp.where(ridx < rows, d, 0.0)
    acc_ref[...] += jnp.sum(d * d, keepdims=True)

    @pl.when(j == pl.num_programs(1) - 1)
    def _emit():
        mse = acc_ref[...] * inv_n
        o_ref[...] = 10.0 * jnp.log10(1.0 / mse)


def psnr_per_sample(x, y):
    N, C, H, W = x.shape
    P = C * H * W
    assert P % 128 == 0, "C*H*W must be a multiple of 128 for this kernel"
    rows = P // 128
    tile_rows = rows if rows <= 512 else 512
    nchunks = (rows + tile_rows - 1) // tile_rows

    xr = x.reshape(N, rows, 128).astype(jnp.float32)
    yr = y.reshape(N, rows, 128).astype(jnp.float32)

    kern = functools.partial(_psnr_kernel, rows=rows, tile_rows=tile_rows, inv_n=1.0 / P)
    out = pl.pallas_call(
        kern,
        out_shape=jax.ShapeDtypeStruct((N, 1, 1), jnp.float32),
        grid=(N, nchunks),
        in_specs=[
            pl.BlockSpec((None, tile_rows, 128), lambda i, j: (i, j, 0)),
            pl.BlockSpec((None, tile_rows, 128), lambda i, j: (i, j, 0)),
        ],
        out_specs=pl.BlockSpec((None, 1, 1), lambda i, j: (i, 0, 0)),
        scratch_shapes=[pltpu.VMEM((1, 1), jnp.float32)],
        compiler_params=pltpu.CompilerParams(
            dimension_semantics=("parallel", "arbitrary")),
    )(xr, yr)
    return out[:, 0, 0]


# ---------------------------------------------------------------------------
# MS-SSIM: one fused kernel per (n,c) plane. All 5 scales computed in VMEM.
# Blur and 2x avg-pool are banded-matrix matmuls on the MXU.
# ---------------------------------------------------------------------------
def _shifted_diag(n_rows, n_cols, taps, flip):
    """Banded matrix. flip=False: M[i, i+k] = taps[k]. flip=True: M[j+k, j] = taps[k]."""
    r = jax.lax.broadcasted_iota(jnp.int32, (n_rows, n_cols), 0)
    c = jax.lax.broadcasted_iota(jnp.int32, (n_rows, n_cols), 1)
    d = (r - c) if flip else (c - r)
    m = jnp.zeros((n_rows, n_cols), jnp.float32)
    for k, w in enumerate(taps):
        m = m + jnp.where(d == k, jnp.float32(w), jnp.float32(0.0))
    return m


def _pool_mat(n_rows, n_cols, flip):
    """2x average-pool matrix. flip=False: (H/2,H) left matrix. flip=True: (W,W/2) right."""
    r = jax.lax.broadcasted_iota(jnp.int32, (n_rows, n_cols), 0)
    c = jax.lax.broadcasted_iota(jnp.int32, (n_rows, n_cols), 1)
    d = (r - 2 * c) if flip else (c - 2 * r)
    return jnp.where((d == 0) | (d == 1), jnp.float32(0.5), jnp.float32(0.0))


def _msssim_plane_kernel(x_ref, y_ref, o_ref, *, win, c1, c2, levels):
    X = x_ref[...].astype(jnp.float32)
    Y = y_ref[...].astype(jnp.float32)
    ws = len(win)

    lane = jax.lax.broadcasted_iota(jnp.int32, (8, 128), 1)
    packed = jnp.zeros((8, 128), jnp.float32)   # lanes 0..3: cs per level, lane 4: ssim

    for lvl in range(levels):
        H, W = X.shape
        Ho, Wo = H - ws + 1, W - ws + 1

        # Separable valid Gaussian blur as two MXU matmuls: Bv @ A @ Bh.
        Bv = _shifted_diag(Ho, H, win, flip=False)   # (Ho, H)
        Bh = _shifted_diag(W, Wo, win, flip=True)    # (W, Wo)

        def blur2(a, bv=Bv, bh=Bh):
            t = jnp.dot(a, bh, preferred_element_type=jnp.float32)
            return jnp.dot(bv, t, preferred_element_type=jnp.float32)

        mu1 = blur2(X)
        mu2 = blur2(Y)
        sxx = blur2(X * X)
        syy = blur2(Y * Y)
        sxy = blur2(X * Y)

        mu1_sq = mu1 * mu1
        mu2_sq = mu2 * mu2
        mu12 = mu1 * mu2
        sigma1_sq = sxx - mu1_sq
        sigma2_sq = syy - mu2_sq
        sigma12 = sxy - mu12

        cs_map = (2.0 * sigma12 + c2) / (sigma1_sq + sigma2_sq + c2)
        ssim_map = ((2.0 * mu12 + c1) / (mu1_sq + mu2_sq + c1)) * cs_map

        if lvl < levels - 1:
            packed = packed + jnp.where(lane == lvl, jnp.mean(cs_map), 0.0)
            # Fused 2x average-pool (exactly reshape(...).mean for even dims), on the MXU.
            Pv = _pool_mat(H // 2, H, flip=False)    # (H/2, H)
            Ph = _pool_mat(W, W // 2, flip=True)     # (W, W/2)
            X = jnp.dot(Pv, jnp.dot(X, Ph, preferred_element_type=jnp.float32),
                        preferred_element_type=jnp.float32)
            Y = jnp.dot(Pv, jnp.dot(Y, Ph, preferred_element_type=jnp.float32),
                        preferred_element_type=jnp.float32)
        else:
            packed = packed + jnp.where(lane == lvl, jnp.mean(ssim_map), 0.0)

    o_ref[...] = packed


def ms_ssim(x, y, data_range=1.0):
    """Multi-scale SSIM matching pytorch_msssim.ms_ssim(size_average=True)."""
    N, C, H, W = x.shape
    win_size, sigma, levels = 11, 1.5, 5
    weights = jnp.array([0.0448, 0.2856, 0.3001, 0.2363, 0.1333], jnp.float32)

    assert (win_size - 1) * (2 ** (levels - 1)) < min(H, W), \
        "image too small for 5-level MS-SSIM"
    h, w = H, W
    for _ in range(levels - 1):
        # TODO(synk): odd spatial sizes would need F.avg_pool2d-style zero padding.
        assert h % 2 == 0 and w % 2 == 0
        h //= 2
        w //= 2

    coords = [i - win_size // 2 for i in range(win_size)]
    g = [math.exp(-(c * c) / (2.0 * sigma * sigma)) for c in coords]
    gs = sum(g)
    win = tuple(v / gs for v in g)

    K1, K2 = 0.01, 0.03
    c1 = (K1 * data_range) ** 2
    c2 = (K2 * data_range) ** 2

    NC = N * C
    Xp = x.reshape(NC, H, W).astype(jnp.float32)
    Yp = y.reshape(NC, H, W).astype(jnp.float32)

    kern = functools.partial(_msssim_plane_kernel, win=win, c1=c1, c2=c2, levels=levels)
    packed = pl.pallas_call(
        kern,
        out_shape=jax.ShapeDtypeStruct((NC, 8, 128), jnp.float32),
        grid=(NC,),
        in_specs=[
            pl.BlockSpec((None, H, W), lambda i: (i, 0, 0)),
            pl.BlockSpec((None, H, W), lambda i: (i, 0, 0)),
        ],
        out_specs=pl.BlockSpec((None, 8, 128), lambda i: (i, 0, 0)),
        compiler_params=pltpu.CompilerParams(dimension_semantics=("parallel",)),
    )(Xp, Yp)

    # lanes 0..3 hold cs of levels 0..3, lane 4 holds ssim of the last level.
    vals = jnp.maximum(packed[:, 0, :levels], 0.0)            # (NC, levels)
    per_plane = jnp.prod(vals ** weights[None, :], axis=1)    # (NC,)
    return jnp.mean(per_plane)                                # size_average=True


# ---------------------------------------------------------------------------
# Metrics.forward equivalent
# ---------------------------------------------------------------------------
def metrics_forward(output, target):
    N, C, H, W = target.shape
    num_pixels = N * H * W

    bpp = sum(neglog2_sum(lk) for lk in output["likelihoods"].values()) / num_pixels

    psnr_vals = psnr_per_sample(output["x_hat"], target)      # (N,)
    psnr = jnp.mean(psnr_vals)

    msssim = ms_ssim(output["x_hat"], target, data_range=1.0)
    return bpp, psnr, msssim


if __name__ == "__main__":
    key = jax.random.PRNGKey(0)
    k1, k2, k3, k4 = jax.random.split(key, 4)

    # Small image-compression-style shapes; spatial must be > 160 for 5-level MS-SSIM.
    N, C, H, W = 2, 3, 176, 176
    target = jax.random.uniform(k1, (N, C, H, W), jnp.float32)
    x_hat = jnp.clip(target + 0.05 * jax.random.normal(k2, (N, C, H, W), jnp.float32), 0.0, 1.0)

    likelihoods = {
        "y": jax.random.uniform(k3, (N, 8, H // 16, W // 16), jnp.float32, 1e-3, 1.0),
        "z": jax.random.uniform(k4, (N, 8, H // 64, W // 64), jnp.float32, 1e-3, 1.0),
    }

    out = metrics_forward({"likelihoods": likelihoods, "x_hat": x_hat}, target)
    out = jax.block_until_ready(out)
    bpp, psnr, msssim = out
    assert jnp.isfinite(bpp) and jnp.isfinite(psnr) and jnp.isfinite(msssim)
    print("KERNEL_OK")
</pallas_src>

<mosaic_0001>
module attributes {stable_mosaic.version = 11 : i64} {
  func.func @_neglog2_sum_kernel(%arg0: i32, %arg1: memref<1x11x11xf32, #tpu.memory_space<vmem>>, %arg2: memref<1x1xf32, #tpu.memory_space<vmem>>, %arg3: memref<1x1xf32, #tpu.memory_space<vmem>>) attributes {dimension_semantics = [#tpu.dimension_semantics<arbitrary>], iteration_bounds = array<i64: 16>, scalar_prefetch = 0 : i64, scratch_operands = 1 : i64, tpu.core_type = #tpu.core_type<tc>, window_params = [{transform_indices = @transform_0, window_bounds = array<i64: 1, 11, 11>}, {pipeline_mode = #tpu.pipeline_mode<synchronous>, transform_indices = @transform_1, window_bounds = array<i64: 1, 1>}]} {
    %c0_i32 = arith.constant 0 : i32
    %0 = arith.cmpi eq, %arg0, %c0_i32 : i32
    %1 = arith.extui %0 : i1 to i32
    %c0_i32_0 = arith.constant 0 : i32
    %2 = arith.cmpi ne, %1, %c0_i32_0 : i32
    scf.if %2 {
      %cst_10 = arith.constant 0.000000e+00 : f32
      %22 = vector.broadcast %cst_10 : f32 to vector<1x1xf32>
      %c0_11 = arith.constant 0 : index
      %c0_12 = arith.constant 0 : index
      %23 = vector.load %arg3[%c0_11, %c0_12] : memref<1x1xf32, #tpu.memory_space<vmem>>, vector<1x1xf32>
      tpu.vector_store %arg3[%c0_11, %c0_12], %22 {strides = array<i32>} : memref<1x1xf32, #tpu.memory_space<vmem>>, vector<1x1xf32>,
    } else {
    }
    %c0 = arith.constant 0 : index
    %c0_1 = arith.constant 0 : index
    %3 = vector.load %arg3[%c0, %c0_1] : memref<1x1xf32, #tpu.memory_space<vmem>>, vector<1x1xf32>
    %c0_2 = arith.constant 0 : index
    %c0_3 = arith.constant 0 : index
    %c0_4 = arith.constant 0 : index
    %4 = vector.load %arg1[%c0_2, %c0_3, %c0_4] : memref<1x11x11xf32, #tpu.memory_space<vmem>>, vector<1x11x11xf32>
    %5 = vector.shape_cast %4 : vector<1x11x11xf32> to vector<11x11xf32>
    %6 = math.log %5 : vector<11x11xf32>
    %cst = arith.constant 2.000000e+00 : f32
    %7 = math.log %cst : f32
    %8 = vector.broadcast %7 : f32 to vector<11x11xf32>
    %9 = arith.divf %6, %8 : vector<11x11xf32>
    %cst_5 = arith.constant 0.000000e+00 : f32
    %10 = vector.broadcast %cst_5 : f32 to vector<11x11xf32>
    %11 = arith.subf %10, %9 : vector<11x11xf32>
    %12 = vector.shape_cast %11 : vector<11x11xf32> to vector<1x11x11xf32>
    %cst_6 = arith.constant dense<0.000000e+00> : vector<1xf32>
    %13 = vector.multi_reduction <add>, %12, %cst_6 [1, 2] : vector<1x11x11xf32> to vector<1xf32>
    %14 = vector.shape_cast %13 : vector<1xf32> to vector<1x1x1xf32>
    %15 = vector.extract %14[0, 0, 0] : f32 from vector<1x1x1xf32>
    %16 = vector.broadcast %15 : f32 to vector<1x1xf32>
    %17 = arith.addf %3, %16 : vector<1x1xf32>
    %c0_7 = arith.constant 0 : index
    %c0_8 = arith.constant 0 : index
    %18 = vector.load %arg3[%c0_7, %c0_8] : memref<1x1xf32, #tpu.memory_space<vmem>>, vector<1x1xf32>
    tpu.vector_store %arg3[%c0_7, %c0_8], %17 {strides = array<i32>} : memref<1x1xf32, #tpu.memory_space<vmem>>, vector<1x1xf32>,
    %c15_i32 = arith.constant 15 : i32
    %19 = arith.cmpi eq, %arg0, %c15_i32 : i32
    %20 = arith.extui %19 : i1 to i32
    %c0_i32_9 = arith.constant 0 : i32
    %21 = arith.cmpi ne, %20, %c0_i32_9 : i32
    scf.if %21 {
      %c0_10 = arith.constant 0 : index
      %c0_11 = arith.constant 0 : index
      %22 = vector.load %arg3[%c0_10, %c0_11] : memref<1x1xf32, #tpu.memory_space<vmem>>, vector<1x1xf32>
      %c0_12 = arith.constant 0 : index
      %c0_13 = arith.constant 0 : index
      %23 = vector.load %arg2[%c0_12, %c0_13] : memref<1x1xf32, #tpu.memory_space<vmem>>, vector<1x1xf32>
      tpu.vector_store %arg2[%c0_12, %c0_13], %22 {strides = array<i32>} : memref<1x1xf32, #tpu.memory_space<vmem>>, vector<1x1xf32>,
    } else {
    }
    return
  }
  func.func @transform_0(%arg0: i32) -> (i32, i32, i32) {
    %c0_i32 = arith.constant 0 : i32
    %c0_i32_0 = arith.constant 0 : i32
    %c0_i32_1 = arith.constant 0 : i32
    return %arg0, %c0_i32, %c0_i32_0 : i32, i32, i32
  }
  func.func @transform_1(%arg0: i32) -> (i32, i32) {
    %c0_i32 = arith.constant 0 : i32
    %c0_i32_0 = arith.constant 0 : i32
    %c0_i32_1 = arith.constant 0 : i32
    return %c0_i32, %c0_i32_0 : i32, i32
  }
}

</mosaic_0001>

<bundles_post_ra>
// kernel: tpu_custom_call.1
= control target key start
LH: loop header
LB: loop body
LE: loop exit
PB: predicated region body
PF: predicated region fallthrough
CT: control target
= control target key end

     0   :  { %6 = vsyncpa [#allocation4], 0  ;;  %s276_s6 = smov 0   ;;  %s319_s0 = inlined_call_operand.vmem [shape: f32[16,11,11], index: 0, kind: input, shape index: {}]   ;;  %s320_s1 = inlined_call_operand.hbm [shape: f32[1,1], index: 1, kind: output, shape index: {}]  }
   0x1 LB: > { %s282_s7 = sadd.s32 4294967295, %s262_s6   ;;  %p194_p0 = scmp.ge.s32.totalorder %s262_s6, 1  ;;  %s262_s6 = sphi %s276_s6, %s12_s6  }
   0x2   : > { %p83_p1 = scmp.lt.s32.totalorder %s262_s6, 17 }
   0x4   : > { %p84_p2 = pnand %p194_p0, %p83_p1 }
   0x5   : > { %p98_p3 = scmp.lt.s32.totalorder (!%p84_p2), %s282_s7, 15  ;;  %p197_p4 = scmp.ne.s32.totalorder (!%p84_p2), %s282_s7, 0 }
   0x6   : > { %87 = sbr.rel (%p84_p2) target bundleno = 284 (0x11c), region = 24 }
   0xd   : > { %s99_s8 = scalar_select %p98_p3, %s282_s7, 15 }
   0xe   : > { %106 = sbr.rel (%p197_p4) target bundleno = 21 (0x15), region = 28  ;;  %vm107_vm0 = vcmask (!%p197_p4), 0   ;;  %v264_v0 = vmov (!%p197_p4), 0.0  }
   0xf   : > { %s203_s9 = sshll.u32 %s99_s8, 4  ;;  %108 = vst.msk [vmem:[#allocation2] sm:$0x1] (!%p197_p4), %vm107_vm0, %v264_v0 }
  0x10   : > { %s102_s12 = scalar_lea.vmem %s319_s0, %s203_s9 }
  0x15 PF: > { %v110_v1 = vld [vmem:[%s102_s12] sm:$0xff]  ;;  %v111_v2 = vld [vmem:[%s102_s12 + $0x8] sm:$0x7]  ;;  %vm121_vm1 = vcmask 89088   ;;  %vm123_vm2 = vcmask 83968   ;;  %vm137_vm3 = vcmask 0  }
  0x16   : > { %222 = vlog2.f32 %v110_v1  ;;  %v109_v21 = vld [vmem:[#allocation2] sm:$0x1]  ;;  %p198_p5 = scmp.ne.s32.totalorder %s282_s7, 15 }
  0x17   : > { %224 = vlog2.f32 %v111_v2 }
  0x20   : > { %v223_v3 = vpop.eup %222 }
  0x21   : > { %v225_v4 = vpop.eup %224  ;;  %v113_v5 = vmul.f32 0.6931472, %v223_v3 }
  0x22   : > { %v115_v6 = vmul.f32 0.6931472, %v225_v4 }
  0x23   : > { %v117_v7 = vmul.f32 1.442695, %v113_v5 }
  0x24   : > { %v118_v8 = vmul.f32 1.442695, %v115_v6 }
  0x25   : > { %v119_v9 = vsub.f32 0.0, %v117_v7 }
  0x26   : > { %v120_v10 = vsub.f32 0.0, %v118_v8 }
  0x27   : > { %v122_v11 = vsel %vm121_vm1, %v119_v9, 0.0 }
  0x28   : > { %v124_v12 = vsel %vm123_vm2, %v120_v10, 0.0 }
  0x29   : > { %v125_v13 = vadd.f32 %v124_v12, %v122_v11 }
  0x2b   : > { %126 = vadd.xlane.f32.xlu0 %v125_v13 }
  0xb8   : > { %v127_v14 = vpop.xlane.xlu0 %126 }
  0xb9   : > { %v128_v15 = vrot.slane %v127_v14, 4 }
  0xbb   : > { %v129_v16 = vadd.f32 %v128_v15, %v127_v14 }
  0xbd   : > { %v130_v17 = vrot.slane %v129_v16, 2 }
  0xbf   : > { %v131_v18 = vadd.f32 %v130_v17, %v129_v16 }
  0xc1   : > { %v132_v19 = vrot.slane %v131_v18, 1 }
  0xc3   : > { %v133_v20 = vadd.f32 %v132_v19, %v131_v18 }
  0xc5   : > { %204 = vpush %v133_v20 }
  0xf4   : > { %142 = sbr.rel (%p198_p5) target bundleno = 259 (0x103), region = 32 }
  0xf6   : > { %s205_s13 = spop %204 }
  0xf7   : > { %v135_v22 = vstv %s205_s13 }
  0xf8   : > { %v136_v23 = vadd.f32 %v135_v22, %v109_v21 }
  0xfa   : > { %138 = vst.msk [vmem:[#allocation2] sm:$0x1] %vm137_vm3, %v136_v23 }
 0x101   : > { %v143_v24 = vld [vmem:[#allocation2] sm:$0x1] }
 0x102   : > { %144 = vst.msk [vmem:[#allocation3] sm:$0x1] %vm137_vm3, %v143_v24 }
 0x103 PF: > { %p210_p6 = scmp.eq.s32.totalorder %s282_s7, 15  ;;  %s265_s14 = smov [#allocation3]  }
 0x104   : > { %s152_s15 = sshll.u32 %s265_s14, 4  ;;  %s153_s15 = int_to_ptr.vmem [resolvable:$true] %s152_s15 }
 0x105   : > { %s226_s16 = scalar_lea.vmem %s153_s15, 16  ;;  %s232_s17 = scalar_lea.vmem %s153_s15, 32 }
 0x106   : > { %p227_p7 = scmp.ne.s32.totalorder %s153_s15, %s226_s16  ;;  %p233_p10 = scmp.lt.s32.totalorder %s153_s15, %s153_s15 }
 0x107   : > { %p234_p11 = scmp.lt.s32.totalorder %s232_s17, %s226_s16 }
 0x108   : > { %p228_p8 = pnand %p227_p7, %p210_p6 }
 0x109   : > { %p235_p12 = por %p234_p11, %p233_p10 }
 0x10a   : > { %p229_p9 = pneg %p228_p8 }
 0x10c   : > { %p236_p13 = pnand %p235_p12, %p229_p9 }
 0x10e   : > { %239 = shalt.err (!%p236_p13)
}
 0x10f   : > { %s240_s20 = scalar_lea.hbm %s320_s1, 16 }
 0x110   : > { %p241_p0 = scmp.ne.s32.totalorder %s320_s1, %s240_s20  ;;  %p246_p3 = scmp.lt.u32.totalorder %s240_s20, %s320_s1 }
 0x112   : > { %p242_p1 = pnand %p241_p0, %p210_p6 }
 0x114   : > { %p243_p2 = pneg %p242_p1 }
 0x116   : > { %p248_p4 = pnand %p246_p3, %p243_p2 }
 0x118   : > { %251 = shalt.err (!%p248_p4)
}
 0x119   : > { %207 = dma.vmem_to_hbm [thread:$0]  (%p210_p6), %s153_s15, 16, %s320_s1, [#allocation4]  }
 0x11a   : > { %257 = dma.done.wait (%p210_p6), [#allocation4], 16  }
 0x11b   : > { %259 = vsyncadd (%p210_p6), [#allocation4], 4294967280 }
 0x11c PF: > { %s12_s6 = sadd.s32 1, %s262_s6  }
 0x11d   : > { %p9_p5 = scmp.ge.s32.totalorder %s12_s6, 18  }
 0x11f   :  { %11 = sbr.rel (!%p9_p5) target bundleno = 1 (0x1), region = 59 }
 0x126   :  { %165 = vsyncpa [#allocation4], 1 }
 0x127   :  { %167 = vsyncpa [#allocation4 + $0x1], 1 }

</bundles_post_ra>
